<compile_context>
chip_gen: v5e
topology: v5e:2x2
jax: 0.10.0
libtpu: 0.0.40
codegen_flags: <defaults>
</compile_context>

<pallas_src>
import functools

import jax
import jax.numpy as jnp
from jax.experimental import pallas as pl
from jax.experimental.pallas import tpu as pltpu


def _round_up(n, m):
    return ((n + m - 1) // m) * m


def encoder_kernel(x_ref, w1_ref, b1_ref, w2_ref, b2_ref, loc_ref, scale_ref,
                   *, z_what):
    # fc1 + ReLU: (TM, K) @ (K, Hp) -> (TM, Hp), f32 MXU accumulation,
    # f32 elementwise (v5e-safe).  Hp is a multiple of 128 (full-lane vregs).
    h = jnp.dot(x_ref[...], w1_ref[...], preferred_element_type=jnp.float32)
    h = jnp.maximum(h + b1_ref[...], 0.0)

    # fc2 fused (loc + scale halves in one matmul): (TM, Hp) @ (Hp, 2*z_what).
    y = jnp.dot(h.astype(w2_ref.dtype), w2_ref[...],
                preferred_element_type=jnp.float32)
    y = y + b2_ref[...]

    # Split into the two narrow outputs; stable softplus on the scale half
    # (EUP exp / log1p).  Only useful lanes are written back to HBM.
    loc_ref[...] = y[:, :z_what]
    s = y[:, z_what:]
    scale_ref[...] = jnp.maximum(s, 0.0) + jnp.log1p(jnp.exp(-jnp.abs(s)))


def prepare_params(params, *, compute_dtype=jnp.float32):
    """One-time parameter preparation (hoisted out of encoder_forward).

    Zero-pads the hidden dim to a multiple of 128 (exact math, full-lane
    vregs in the kernel) and optionally downcasts the weights (bf16-in-HBM
    mode for v6e/v7x).  Biases stay f32 (added after f32 accumulation).
    """
    w1, b1, w2, b2 = params["w1"], params["b1"], params["w2"], params["b2"]
    hidden = w1.shape[1]
    Hp = _round_up(hidden, 128)
    return {
        "w1": jnp.pad(w1, ((0, 0), (0, Hp - hidden))).astype(compute_dtype),
        "b1": jnp.pad(b1, ((0, 0), (0, Hp - hidden))).astype(jnp.float32),
        "w2": jnp.pad(w2, ((0, Hp - hidden), (0, 0))).astype(compute_dtype),
        "b2": b2.astype(jnp.float32),
    }


def encoder_forward(obj, prepared, *, tm_cap=512):
    """obj: (B, 1, H, W).  prepared: output of prepare_params.

    Returns (z_what_loc, z_what_scale), each (B, z_what) float32.
    tm_cap: row-tile cap; sweep 512-1024 per chip generation.
    """
    B = obj.shape[0]
    x = obj.reshape(B, -1)                      # (B, K) glue reshape
    K = x.shape[1]
    w1, b1, w2, b2 = prepared["w1"], prepared["b1"], prepared["w2"], prepared["b2"]
    Hp = w1.shape[1]
    N = w2.shape[1]
    z_what = N // 2
    assert w1.shape[0] == K, "object_size mismatch between input and params"

    if x.dtype != w1.dtype:
        # bf16-in-HBM mode: cast once at the call boundary (no-op for f32).
        x = x.astype(w1.dtype)

    # Row tile: big tiles amortize the ~0.35 us per-grid-step overhead, but
    # keep >= 2 grid steps whenever B allows it so the "parallel" axis shards
    # across both TensorCores on v7x.  No row padding: cdiv grid + ragged
    # last block (row-independent math; pad-row outputs are discarded).
    TM = min(tm_cap, _round_up(max(pl.cdiv(B, 2), 1), 8))
    grid = (pl.cdiv(B, TM),)

    kernel = functools.partial(encoder_kernel, z_what=z_what)

    loc, scale = pl.pallas_call(
        kernel,
        out_shape=(jax.ShapeDtypeStruct((B, z_what), jnp.float32),
                   jax.ShapeDtypeStruct((B, z_what), jnp.float32)),
        grid_spec=pltpu.PrefetchScalarGridSpec(
            num_scalar_prefetch=0,
            grid=grid,
            in_specs=[
                pl.BlockSpec((TM, K), lambda i: (i, 0)),    # x rows (tiled, full-K)
                pl.BlockSpec((K, Hp), lambda i: (0, 0)),    # w1 (VMEM-resident)
                pl.BlockSpec((1, Hp), lambda i: (0, 0)),    # b1 (resident)
                pl.BlockSpec((Hp, N), lambda i: (0, 0)),    # w2 fused loc+scale
                pl.BlockSpec((1, N), lambda i: (0, 0)),     # b2 (resident)
            ],
            out_specs=[
                pl.BlockSpec((TM, z_what), lambda i: (i, 0)),   # z_what_loc
                pl.BlockSpec((TM, z_what), lambda i: (i, 0)),   # z_what_scale
            ],
        ),
        compiler_params=pltpu.CompilerParams(
            dimension_semantics=("parallel",),
            vmem_limit_bytes=32 * 1024 * 1024,   # explicit: safe vs v5e's 16 MiB default
        ),
    )(x, w1, b1, w2, b2)
    return loc, scale


def init_params(key, object_size, hidden, z_what):
    """Deterministic synthetic parameters (PyTorch Linear shapes, stored transposed)."""
    k1, k2, k3, k4 = jax.random.split(key, 4)
    s1 = 1.0 / jnp.sqrt(object_size)
    s2 = 1.0 / jnp.sqrt(hidden)
    return {
        "w1": jax.random.uniform(k1, (object_size, hidden), jnp.float32, -s1, s1),
        "b1": jax.random.uniform(k2, (1, hidden), jnp.float32, -s1, s1),
        "w2": jax.random.uniform(k3, (hidden, 2 * z_what), jnp.float32, -s2, s2),
        "b2": jax.random.uniform(k4, (1, 2 * z_what), jnp.float32, -s2, s2),
    }


if __name__ == "__main__":
    # arch: object_size = H*W = 16*16 = 256, encoder_hidden_size = 32, z_what_size = 8
    B, H, W = 2, 16, 16
    hidden, z_what = 32, 8
    object_size = H * W

    key = jax.random.PRNGKey(0)
    k_obj, k_par = jax.random.split(key)
    obj = jax.random.normal(k_obj, (B, 1, H, W), jnp.float32)
    params = init_params(k_par, object_size, hidden, z_what)
    prepared = prepare_params(params)       # one-time padding, hoisted out of forward

    loc, scale = encoder_forward(obj, prepared)
    jax.block_until_ready((loc, scale))

    # Reference check in plain JAX
    x = obj.reshape(B, -1)
    h_ref = jnp.maximum(x @ params["w1"] + params["b1"], 0.0)
    y_ref = h_ref @ params["w2"] + params["b2"]
    assert loc.shape == (B, z_what) and scale.shape == (B, z_what)
    assert jnp.allclose(loc, y_ref[:, :z_what], atol=1e-5), "loc mismatch"
    assert jnp.allclose(scale, jax.nn.softplus(y_ref[:, z_what:]), atol=1e-5), "scale mismatch"

    # Larger, non-multiple batch: exercises the ragged cdiv grid (no wrapper
    # row padding) and the >=2-step parallel axis (v7x megacore path).
    B2 = 600
    obj2 = jax.random.normal(jax.random.PRNGKey(1), (B2, 1, H, W), jnp.float32)
    loc2, scale2 = encoder_forward(obj2, prepared)
    jax.block_until_ready((loc2, scale2))
    x2 = obj2.reshape(B2, -1)
    h2 = jnp.maximum(x2 @ params["w1"] + params["b1"], 0.0)
    y2 = h2 @ params["w2"] + params["b2"]
    assert jnp.allclose(loc2, y2[:, :z_what], atol=1e-5), "batched loc mismatch"
    assert jnp.allclose(scale2, jax.nn.softplus(y2[:, z_what:]), atol=1e-5), "batched scale mismatch"

    print("KERNEL_OK")
</pallas_src>

<mosaic_0001>
module attributes {stable_mosaic.version = 11 : i64} {
  func.func @encoder_kernel(%arg0: i32, %arg1: memref<8x256xf32, #tpu.memory_space<vmem>>, %arg2: memref<256x128xf32, #tpu.memory_space<vmem>>, %arg3: memref<1x128xf32, #tpu.memory_space<vmem>>, %arg4: memref<128x16xf32, #tpu.memory_space<vmem>>, %arg5: memref<1x16xf32, #tpu.memory_space<vmem>>, %arg6: memref<8x8xf32, #tpu.memory_space<vmem>>, %arg7: memref<8x8xf32, #tpu.memory_space<vmem>>) attributes {dimension_semantics = [#tpu.dimension_semantics<parallel>], iteration_bounds = array<i64: 1>, scalar_prefetch = 0 : i64, scratch_operands = 0 : i64, tpu.core_type = #tpu.core_type<tc>, window_params = [{transform_indices = @transform_0, window_bounds = array<i64: 8, 256>}, {pipeline_mode = #tpu.pipeline_mode<synchronous>, transform_indices = @transform_1, window_bounds = array<i64: 256, 128>}, {pipeline_mode = #tpu.pipeline_mode<synchronous>, transform_indices = @transform_2, window_bounds = array<i64: 1, 128>}, {pipeline_mode = #tpu.pipeline_mode<synchronous>, transform_indices = @transform_3, window_bounds = array<i64: 128, 16>}, {pipeline_mode = #tpu.pipeline_mode<synchronous>, transform_indices = @transform_4, window_bounds = array<i64: 1, 16>}, {transform_indices = @transform_5, window_bounds = array<i64: 8, 8>}, {transform_indices = @transform_6, window_bounds = array<i64: 8, 8>}]} {
    %c0 = arith.constant 0 : index
    %c0_0 = arith.constant 0 : index
    %0 = vector.load %arg1[%c0, %c0_0] : memref<8x256xf32, #tpu.memory_space<vmem>>, vector<8x256xf32>
    %c0_1 = arith.constant 0 : index
    %c0_2 = arith.constant 0 : index
    %1 = vector.load %arg2[%c0_1, %c0_2] : memref<256x128xf32, #tpu.memory_space<vmem>>, vector<256x128xf32>
    %cst = arith.constant dense<0.000000e+00> : vector<8x128xf32>
    %2 = tpu.matmul %0, %1, %cst {dimension_numbers = #tpu.dot_dimension_numbers<[1], [0], [0], [1], [0, 0, 1, 1], [], []>} : vector<8x256xf32>, vector<256x128xf32>, vector<8x128xf32> -> vector<8x128xf32>
    %c0_3 = arith.constant 0 : index
    %c0_4 = arith.constant 0 : index
    %3 = vector.load %arg3[%c0_3, %c0_4] : memref<1x128xf32, #tpu.memory_space<vmem>>, vector<1x128xf32>
    %4 = vector.broadcast %3 : vector<1x128xf32> to vector<8x128xf32>
    %5 = arith.addf %2, %4 : vector<8x128xf32>
    %cst_5 = arith.constant 0.000000e+00 : f32
    %6 = vector.broadcast %cst_5 : f32 to vector<8x128xf32>
    %7 = arith.maximumf %5, %6 : vector<8x128xf32>
    %c0_6 = arith.constant 0 : index
    %c0_7 = arith.constant 0 : index
    %8 = vector.load %arg4[%c0_6, %c0_7] : memref<128x16xf32, #tpu.memory_space<vmem>>, vector<128x16xf32>
    %cst_8 = arith.constant dense<0.000000e+00> : vector<8x16xf32>
    %9 = tpu.matmul %7, %8, %cst_8 {dimension_numbers = #tpu.dot_dimension_numbers<[1], [0], [0], [1], [0, 0, 1, 1], [], []>} : vector<8x128xf32>, vector<128x16xf32>, vector<8x16xf32> -> vector<8x16xf32>
    %c0_9 = arith.constant 0 : index
    %c0_10 = arith.constant 0 : index
    %10 = vector.load %arg5[%c0_9, %c0_10] : memref<1x16xf32, #tpu.memory_space<vmem>>, vector<1x16xf32>
    %11 = vector.broadcast %10 : vector<1x16xf32> to vector<8x16xf32>
    %12 = arith.addf %9, %11 : vector<8x16xf32>
    %13 = vector.extract_strided_slice %12 {offsets = [0, 0], sizes = [8, 8], strides = [1, 1]} : vector<8x16xf32> to vector<8x8xf32>
    %c0_11 = arith.constant 0 : index
    %c0_12 = arith.constant 0 : index
    %14 = vector.load %arg6[%c0_11, %c0_12] : memref<8x8xf32, #tpu.memory_space<vmem>>, vector<8x8xf32>
    tpu.vector_store %arg6[%c0_11, %c0_12], %13 {strides = array<i32>} : memref<8x8xf32, #tpu.memory_space<vmem>>, vector<8x8xf32>,
    %15 = vector.extract_strided_slice %12 {offsets = [0, 8], sizes = [8, 8], strides = [1, 1]} : vector<8x16xf32> to vector<8x8xf32>
    %cst_13 = arith.constant 0.000000e+00 : f32
    %16 = vector.broadcast %cst_13 : f32 to vector<8x8xf32>
    %17 = arith.maximumf %15, %16 : vector<8x8xf32>
    %18 = math.absf %15 : vector<8x8xf32>
    %cst_14 = arith.constant 0.000000e+00 : f32
    %19 = vector.broadcast %cst_14 : f32 to vector<8x8xf32>
    %20 = arith.subf %19, %18 : vector<8x8xf32>
    %21 = math.exp %20 : vector<8x8xf32>
    %22 = math.log1p %21 : vector<8x8xf32>
    %23 = arith.addf %17, %22 : vector<8x8xf32>
    %c0_15 = arith.constant 0 : index
    %c0_16 = arith.constant 0 : index
    %24 = vector.load %arg7[%c0_15, %c0_16] : memref<8x8xf32, #tpu.memory_space<vmem>>, vector<8x8xf32>
    tpu.vector_store %arg7[%c0_15, %c0_16], %23 {strides = array<i32>} : memref<8x8xf32, #tpu.memory_space<vmem>>, vector<8x8xf32>,
    return
  }
  func.func @transform_0(%arg0: i32) -> (i32, i32) {
    %c0_i32 = arith.constant 0 : i32
    %c0_i32_0 = arith.constant 0 : i32
    return %arg0, %c0_i32 : i32, i32
  }
  func.func @transform_1(%arg0: i32) -> (i32, i32) {
    %c0_i32 = arith.constant 0 : i32
    %c0_i32_0 = arith.constant 0 : i32
    %c0_i32_1 = arith.constant 0 : i32
    return %c0_i32, %c0_i32_0 : i32, i32
  }
  func.func @transform_2(%arg0: i32) -> (i32, i32) {
    %c0_i32 = arith.constant 0 : i32
    %c0_i32_0 = arith.constant 0 : i32
    %c0_i32_1 = arith.constant 0 : i32
    return %c0_i32, %c0_i32_0 : i32, i32
  }
  func.func @transform_3(%arg0: i32) -> (i32, i32) {
    %c0_i32 = arith.constant 0 : i32
    %c0_i32_0 = arith.constant 0 : i32
    %c0_i32_1 = arith.constant 0 : i32
    return %c0_i32, %c0_i32_0 : i32, i32
  }
  func.func @transform_4(%arg0: i32) -> (i32, i32) {
    %c0_i32 = arith.constant 0 : i32
    %c0_i32_0 = arith.constant 0 : i32
    %c0_i32_1 = arith.constant 0 : i32
    return %c0_i32, %c0_i32_0 : i32, i32
  }
  func.func @transform_5(%arg0: i32) -> (i32, i32) {
    %c0_i32 = arith.constant 0 : i32
    %c0_i32_0 = arith.constant 0 : i32
    return %arg0, %c0_i32 : i32, i32
  }
  func.func @transform_6(%arg0: i32) -> (i32, i32) {
    %c0_i32 = arith.constant 0 : i32
    %c0_i32_0 = arith.constant 0 : i32
    return %arg0, %c0_i32 : i32, i32
  }
}

</mosaic_0001>

<bundles_post_ra>
// kernel: tpu_custom_call.1
= control target key start
LH: loop header
LB: loop body
LE: loop exit
PB: predicated region body
PF: predicated region fallthrough
CT: control target
= control target key end

     0   :  { %12 = vsyncpa [#allocation3], 0  ;;  %s447_s0 = inlined_call_operand.vmem [shape: f32[2,256], index: 0, kind: input, shape index: {}]   ;;  %s448_s1 = inlined_call_operand.hbm [shape: f32[256,128], index: 1, kind: input, shape index: {}]   ;;  %s449_s2 = inlined_call_operand.vmem [shape: f32[1,128], index: 2, kind: input, shape index: {}]   ;;  %s450_s3 = inlined_call_operand.vmem [shape: f32[128,16], index: 3, kind: input, shape index: {}]   ;;  %s451_s4 = inlined_call_operand.vmem [shape: f32[1,16], index: 4, kind: input, shape index: {}]   ;;  %s452_s5 = inlined_call_operand.hbm [shape: f32[2,8], index: 5, kind: output, shape index: {0}]   ;;  %s453_s6 = inlined_call_operand.hbm [shape: f32[2,8], index: 6, kind: output, shape index: {1}]  }
   0x1   :  { %13 = vsyncpa [#allocation4], 0 }
   0x2   :  { %14 = vsyncpa [#allocation7], 0  ;;  %s21_s23 = sshll.u32 %s448_s1, 4  ;;  %s327_s24 = smov [#allocation2]   ;;  %s22_s23 = int_to_ptr.hbm [resolvable:$true] %s21_s23 }
   0x3   :  { %s23_s25 = sshll.u32 %s327_s24, 4  ;;  %s328_s26 = smov 128   ;;  %s24_s25 = int_to_ptr.vmem [resolvable:$true] %s23_s25 }
   0x4   :  { %s329_s27 = smov 8  }
   0x5   :  { %29 = dma.hbm_to_vmem [thread:$0]  %s22_s23, 4096, %s24_s25, [#allocation3], %s328_s26, %s328_s26, %s329_s27  }
   0x6   :  { %321 = dma.done.wait [#allocation3], 4096  }
   0x7   :  { %322 = vsyncadd [#allocation3], 4294963200  ;;  %v59_v0 = vld [vmem:[#allocation2 + $0x78] sm:$0xff]  ;;  %v58_v1 = vld [vmem:[#allocation2 + $0x70] sm:$0xff]  ;;  %vm176_vm0 = vcmask 64512  }
   0x8   :  { %v75_v2 = vld [vmem:[#allocation2 + $0xf8] sm:$0xff]  ;;  %95 = vmatpush.msra.mxu0 %v59_v0  ;;  %v74_v3 = vld [vmem:[#allocation2 + $0xf0] sm:$0xff]  ;;  %v57_v4 = vld [vmem:[#allocation2 + $0x68] sm:$0xff] }
   0x9   :  { %115 = vmatpush.msra.mxu1 %v75_v2  ;;  %v73_v5 = vld [vmem:[#allocation2 + $0xe8] sm:$0xff]  ;;  %v56_v6 = vld [vmem:[#allocation2 + $0x60] sm:$0xff]  ;;  %v55_v8 = vld [vmem:[#allocation2 + $0x58] sm:$0xff] }
   0xa   :  { %96 = vmatpush.msra.mxu0 %v58_v1  ;;  %v72_v7 = vld [vmem:[#allocation2 + $0xe0] sm:$0xff]  ;;  %v71_v9 = vld [vmem:[#allocation2 + $0xd8] sm:$0xff]  ;;  %v54_v10 = vld [vmem:[#allocation2 + $0x50] sm:$0xff] }
   0xb   :  { %116 = vmatpush.msra.mxu1 %v74_v3  ;;  %v70_v11 = vld [vmem:[#allocation2 + $0xd0] sm:$0xff]  ;;  %v53_v12 = vld [vmem:[#allocation2 + $0x48] sm:$0xff]  ;;  %v40_v14 = vld [vmem:[%s447_s0] sm:$0xf] }
   0xc   :  { %97 = vmatpush.msra.mxu0 %v57_v4  ;;  %v69_v13 = vld [vmem:[#allocation2 + $0xc8] sm:$0xff]  ;;  %v41_v15 = vld [vmem:[%s447_s0 + $0x4] sm:$0xf]  ;;  %v42_v16 = vld [vmem:[%s447_s0 + $0x8] sm:$0xf] }
   0xd   :  { %117 = vmatpush.msra.mxu1 %v73_v5  ;;  %v43_v17 = vld [vmem:[%s447_s0 + $0xc] sm:$0xf]  ;;  %84 = vst [vmem:[#allocation1] ss:$4 sm:$0xff] %v40_v14  ;;  %v151_v20 = vld [vmem:[%s450_s3 + $0x78] sm:$0xff]  ;;  %v150_v21 = vld [vmem:[%s450_s3 + $0x70] sm:$0xff] }
   0xe   :  { %98 = vmatpush.msra.mxu0 %v56_v6  ;;  %v52_v18 = vld [vmem:[#allocation2 + $0x40] sm:$0xff]  ;;  %86 = vst [vmem:[#allocation1 + $0x1] ss:$4 sm:$0xff] %v41_v15  ;;  %v51_v22 = vld [vmem:[#allocation2 + $0x38] sm:$0xff]  ;;  %156 = vmatpush.msra.mxu2 %v151_v20  ;;  %v50_v25 = vld [vmem:[#allocation2 + $0x30] sm:$0xff] }
   0xf   :  { %118 = vmatpush.msra.mxu1 %v72_v7  ;;  %v68_v19 = vld [vmem:[#allocation2 + $0xc0] sm:$0xff]  ;;  %88 = vst [vmem:[#allocation1 + $0x2] ss:$4 sm:$0xff] %v42_v16  ;;  %v67_v23 = vld [vmem:[#allocation2 + $0xb8] sm:$0xff]  ;;  %v66_v26 = vld [vmem:[#allocation2 + $0xb0] sm:$0xff] }
  0x10   :  { %99 = vmatpush.msra.mxu0 %v55_v8  ;;  %90 = vst [vmem:[#allocation1 + $0x3] ss:$4 sm:$0xff] %v43_v17  ;;  %v149_v24 = vld [vmem:[%s450_s3 + $0x68] sm:$0xff]  ;;  %157 = vmatpush.msra.mxu2 %v150_v21  ;;  %v148_v27 = vld [vmem:[%s450_s3 + $0x60] sm:$0xff]  ;;  %v49_v28 = vld [vmem:[#allocation2 + $0x28] sm:$0xff] }
  0x11   :  { %119 = vmatpush.msra.mxu1 %v71_v9  ;;  %v65_v29 = vld [vmem:[#allocation2 + $0xa8] sm:$0xff]  ;;  %v147_v30 = vld [vmem:[%s450_s3 + $0x58] sm:$0xff]  ;;  %v48_v31 = vld [vmem:[#allocation2 + $0x20] sm:$0xff] }
  0x12   :  { %100 = vmatpush.msra.mxu0 %v54_v10  ;;  %158 = vmatpush.msra.mxu2 %v149_v24  ;;  %v64_v32 = vld [vmem:[#allocation2 + $0xa0] sm:$0xff]  ;;  %v146_v33 = vld [vmem:[%s450_s3 + $0x50] sm:$0xff]  ;;  %v47_v34 = vld [vmem:[#allocation2 + $0x18] sm:$0xff] }
  0x13   :  { %120 = vmatpush.msra.mxu1 %v70_v11  ;;  %v63_v35 = vld [vmem:[#allocation2 + $0x98] sm:$0xff]  ;;  %v145_v36 = vld [vmem:[%s450_s3 + $0x48] sm:$0xff]  ;;  %v46_v37 = vld [vmem:[#allocation2 + $0x10] sm:$0xff] }
  0x14   :  { %101 = vmatpush.msra.mxu0 %v53_v12  ;;  %159 = vmatpush.msra.mxu2 %v148_v27  ;;  %v62_v38 = vld [vmem:[#allocation2 + $0x90] sm:$0xff]  ;;  %v144_v39 = vld [vmem:[%s450_s3 + $0x40] sm:$0xff]  ;;  %v45_v40 = vld [vmem:[#allocation2 + $0x8] sm:$0xff] }
  0x15   :  { %121 = vmatpush.msra.mxu1 %v69_v13  ;;  %v61_v41 = vld [vmem:[#allocation2 + $0x88] sm:$0xff]  ;;  %v143_v42 = vld [vmem:[%s450_s3 + $0x38] sm:$0xff]  ;;  %v44_v43 = vld [vmem:[#allocation2] sm:$0xff] }
  0x16   :  { %102 = vmatpush.msra.mxu0 %v52_v18  ;;  %160 = vmatpush.msra.mxu2 %v147_v30  ;;  %v60_v44 = vld [vmem:[#allocation2 + $0x80] sm:$0xff]  ;;  %v142_v47 = vld [vmem:[%s450_s3 + $0x30] sm:$0xff]  ;;  %v140_v49 = vld [vmem:[%s450_s3 + $0x20] sm:$0xff] }
  0x17   :  { %122 = vmatpush.msra.mxu1 %v68_v19  ;;  %v91_v45 = vld.sshfl [vmem:[#allocation1] sm:$0xff pattern:$0x73625140]  ;;  %v92_v46 = vld.sshfl [vmem:[#allocation1 + $0x8] sm:$0xff pattern:$0x73625140] }
  0x18   :  { %103 = vmatpush.msra.mxu0 %v51_v22  ;;  %161 = vmatpush.msra.mxu2 %v146_v33  ;;  %v141_v48 = vld [vmem:[%s450_s3 + $0x28] sm:$0xff]  ;;  %v139_v50 = vld [vmem:[%s450_s3 + $0x18] sm:$0xff]  ;;  %v138_v51 = vld [vmem:[%s450_s3 + $0x10] sm:$0xff] }
  0x19   :  { %123 = vmatpush.msra.mxu1 %v67_v23  ;;  %v137_v52 = vld [vmem:[%s450_s3 + $0x8] sm:$0xff]  ;;  %v136_v53 = vld [vmem:[%s450_s3] sm:$0xff] }
  0x1a   :  { %104 = vmatpush.msra.mxu0 %v50_v25  ;;  %162 = vmatpush.msra.mxu2 %v145_v36  ;;  %v243_v54 = vld [vmem:[%s449_s2] ss:$0 sm:$0xff]  ;;  %s330_s2 = smov 120  }
  0x1b   :  { %124 = vmatpush.msra.mxu1 %v66_v26  ;;  %v244_v60 = vld [vmem:[%s451_s4] ss:$0 sm:$0xff] }
  0x1c   :  { %105 = vmatpush.msra.mxu0 %v49_v28  ;;  %163 = vmatpush.msra.mxu2 %v144_v39 }
  0x1d   :  { %125 = vmatpush.msra.mxu1 %v65_v29 }
  0x1e   :  { %106 = vmatpush.msra.mxu0 %v48_v31  ;;  %164 = vmatpush.msra.mxu2 %v143_v42 }
  0x1f   :  { %126 = vmatpush.msra.mxu1 %v64_v32 }
  0x20   :  { %107 = vmatpush.msra.mxu0 %v47_v34  ;;  %165 = vmatpush.msra.mxu2 %v142_v47 }
  0x21   :  { %127 = vmatpush.msra.mxu1 %v63_v35 }
  0x22   :  { %108 = vmatpush.msra.mxu0 %v46_v37  ;;  %166 = vmatpush.msra.mxu2 %v141_v48 }
  0x23   :  { %128 = vmatpush.msra.mxu1 %v62_v38 }
  0x24   :  { %109 = vmatpush.msra.mxu0 %v45_v40  ;;  %167 = vmatpush.msra.mxu2 %v140_v49 }
  0x25   :  { %129 = vmatpush.msra.mxu1 %v61_v41 }
  0x26   :  { %110 = vmatpush.msra.mxu0 %v44_v43  ;;  %168 = vmatpush.msra.mxu2 %v139_v50 }
  0x27   :  { %130 = vmatpush.msra.mxu1 %v60_v44  ;;  %111 = vmatmul.f32.vlgmr.msra.gmra.mxu0 %v91_v45 }
  0x28   :  { %131 = vmatmul.f32.vlgmr.msra.gmra.mxu1 %v92_v46  ;;  %169 = vmatpush.msra.mxu2 %v138_v51 }
  0x2a   :  { %170 = vmatpush.msra.mxu2 %v137_v52 }
  0x2c   :  { %171 = vmatpush.msra.mxu2 %v136_v53 }
  0xa4   :  { %v112_v55 = vpop.f32.mrf.mxu0 }
  0xa5   :  { %v132_v56 = vpop.f32.mrf.mxu1  ;;  %v113_v57 = vadd.f32 %v243_v54, %v112_v55 }
  0xa7   :  { %v133_v58 = vadd.f32 %v132_v56, %v113_v57 }
  0xa9   :  { %v135_v59 = vmax.f32 %v133_v58, 0.0 }
  0xab   :  { %172 = vmatmul.f32.vlgmr.msra.gmra.mxu2 %v135_v59 }
 0x12e   :  { %v173_v61 = vpop.f32.mrf.mxu2 }
 0x12f   :  { %v174_v62 = vadd.f32 %v244_v60, %v173_v61 }
 0x131   :  { %v179_v63 = vand.u32 2147483647, %v174_v62  ;;  %177 = vst.msk [vmem:[#allocation5] sm:$0xff] %vm176_vm0, %v174_v62  ;;  %v178_v10 = vmax.f32 %v174_v62, 0.0 }
 0x133   :  { %v180_v0 = vsub.f32 0.0, %v179_v63 }
 0x135   :  { %v181_v1 = vmul.f32 1.442695, %v180_v0 }
 0x137   :  { %245 = vpow2.f32 %v181_v1 }
 0x13d   :  { %v246_v2 = vpop.eup %245 }
 0x13e   :  { %v183_v3 = vadd.f32 1.0, %v246_v2  ;;  %v186_v4 = vmul.f32 -0.5, %v246_v2  ;;  %v189_v6 = vand.u32 2147483647, %v246_v2 }
 0x140   :  { %247 = vlog2.f32 %v183_v3  ;;  %v187_v5 = vadd.f32 1.0, %v186_v4  ;;  %vm190_vm1 = vcmp.lt.f32.partialorder %v189_v6, 0.0004427343 }
 0x142   :  { %v188_v9 = vmul.f32 %v246_v2, %v187_v5 }
 0x146   :  { %v248_v7 = vpop.eup %247 }
 0x147   :  { %v185_v8 = vmul.f32 0.6931472, %v248_v7 }
 0x149   :  { %v191_v11 = vsel %vm190_vm1, %v188_v9, %v185_v8 }
 0x14a   :  { %v192_v12 = vadd.f32 %v191_v11, %v178_v10 }
 0x14c   :  { %194 = vrot.lane.b32.xlu0 %v192_v12, %s330_s2 }
 0x1be   :  { %v195_v13 = vpop.permute.xlu0 %194 }
 0x1bf   :  { %197 = vst.msk [vmem:[#allocation6] sm:$0xff] %vm176_vm0, %v195_v13 }
 0x1c0   :  { %201 = vsyncadd [#allocation4], 96  ;;  %s204_s20 = sshll.u32 %s452_s5, 4  ;;  %s331_s21 = smov [#allocation5]   ;;  %s205_s20 = int_to_ptr.hbm [resolvable:$true] %s204_s20 }
 0x1c1   :  { %s202_s22 = sshll.u32 %s331_s21, 4  ;;  %s332_s23 = smov 32   ;;  %s203_s22 = int_to_ptr.vmem [resolvable:$true] %s202_s22 }
 0x1c2   :  { %s333_s24 = smov 2  }
 0x1c3   :  { %210 = dma.vmem_to_hbm [thread:$0]  %s203_s22, 32, %s205_s20, [#allocation4], %s332_s23, %s332_s23, %s333_s24  }
 0x1c4   :  { %214 = vsyncadd [#allocation7], 96  ;;  %s217_s27 = sshll.u32 %s453_s6, 4  ;;  %s334_s1 = smov [#allocation6]   ;;  %s218_s27 = int_to_ptr.hbm [resolvable:$true] %s217_s27 }
 0x1c5   :  { %s215_s28 = sshll.u32 %s334_s1, 4  ;;  %s216_s28 = int_to_ptr.vmem [resolvable:$true] %s215_s28 }
 0x1c6   :  { %223 = dma.vmem_to_hbm [thread:$0]  %s216_s28, 32, %s218_s27, [#allocation7], %s332_s23, %s332_s23, %s333_s24  }
 0x1c7   :  { %323 = dma.done.wait [#allocation4], 128  }
 0x1c8   :  { %324 = vsyncadd [#allocation4], 4294967168 }
 0x1c9   :  { %325 = dma.done.wait [#allocation7], 128  }
 0x1ca   :  { %326 = vsyncadd [#allocation7], 4294967168 }
 0x1cb   :  { %232 = vsyncpa [#allocation3], 1 }
 0x1cc   :  { %233 = vsyncpa [#allocation4], 1 }
 0x1cd   :  { %234 = vsyncpa [#allocation7], 1 }

</bundles_post_ra>
